<compile_context>
chip_gen: v7x
topology: tpu7x:2x2x1
jax: 0.10.0
libtpu: 0.0.40
codegen_flags: <defaults>
</compile_context>

<pallas_src>
import functools

import jax
import jax.numpy as jnp
from jax import lax
from jax.experimental import pallas as pl
from jax.experimental.pallas import tpu as pltpu


def _round_up(x, m):
    return (x + m - 1) // m * m


def _vmem_budget_bytes():
    """Chip-aware VMEM budget: ~3/4 of physical per-core VMEM, capped at 96 MiB.

    v5e/v6e: 128 MiB physical -> 96 MiB budget.  v7x: 64 MiB/TC -> 48 MiB.
    """
    cap = 64 * 1024 * 1024  # conservative fallback (v7x per-TensorCore)
    try:
        info = pltpu.get_tpu_info()
        cap = int(getattr(info, "vmem_capacity_bytes", cap)) or cap
    except Exception:
        pass
    return min(cap * 3 // 4, 96 * 1024 * 1024)


def _matmul_tile(x_tile, w_tile, w_k_major):
    if w_k_major:
        # Weight tile is (tk, tn): standard K-major contraction, no XLU
        # transpose needed before the MXU.
        return jnp.dot(x_tile, w_tile, preferred_element_type=jnp.float32)
    # Weight tile is (tn, tk) (PyTorch (out, in) layout): contract the shared
    # last dim of both operands.
    return lax.dot_general(
        x_tile, w_tile,
        dimension_numbers=(((1,), (1,)), ((), ())),
        preferred_element_type=jnp.float32,
    )


def _fc_kernel_single(x_ref, w_ref, b_ref, o_ref, *, relu: bool, w_k_major: bool):
    # Whole reduction in one tile: no accumulator RMW, write result directly.
    out = _matmul_tile(x_ref[...], w_ref[...], w_k_major)
    out = out + b_ref[...].astype(jnp.float32)
    if relu:
        out = jnp.maximum(out, 0.0)
    o_ref[...] = out.astype(o_ref.dtype)


def _fc_kernel_multi(x_ref, w_ref, b_ref, o_ref, acc_ref, *, relu: bool,
                     w_k_major: bool):
    k = pl.program_id(2)

    @pl.when(k == 0)
    def _():
        acc_ref[...] = jnp.zeros_like(acc_ref)

    acc_ref[...] += _matmul_tile(x_ref[...], w_ref[...], w_k_major)

    @pl.when(k == pl.num_programs(2) - 1)
    def _():
        out = acc_ref[...] + b_ref[...].astype(jnp.float32)
        if relu:
            out = jnp.maximum(out, 0.0)
        o_ref[...] = out.astype(o_ref.dtype)


def fully_connect(x, weight, bias, relu=True, tm=None, tn=None, tk=None,
                  w_k_major=None):
    """Pallas equivalent of FullyConnect.forward.

    x:      (B, in_size)
    weight: (out_size, in_size)   -- PyTorch nn.Linear layout
    bias:   (out_size,)
    returns (B, out_size)
    """
    B, K = x.shape
    N, K2 = weight.shape
    assert K == K2, "in_size mismatch"

    itemsize = jnp.dtype(x.dtype).itemsize
    sub = 8 * max(1, 4 // itemsize)  # sublane packing: 8 f32 / 16 bf16 / 32 int8
    budget = _vmem_budget_bytes()

    # Roofline-friendly tile defaults; small shapes shrink to their rounded
    # size.  tm=tn=tk=1024 f32 is ~28 MiB double-buffered (fits every chip).
    tm = tm or min(1024, _round_up(B, sub))
    tn = tn or min(1024, _round_up(N, 128))
    tk = tk or min(1024, _round_up(K, 128))
    assert tm % sub == 0 and tn % 128 == 0 and tk % 128 == 0, (
        "tiles must satisfy the TPU layout / packing constraints")

    # Ensure >= 2 output tiles when possible so v7x's second TensorCore gets
    # work from the 'parallel' grid axes.
    if pl.cdiv(B, tm) * pl.cdiv(N, tn) < 2 and tn > 128:
        tn = max(128, _round_up(pl.cdiv(N, 2), 128))

    # Only K needs explicit zero padding (reduction correctness).  Ragged B/N
    # edge blocks are fine: garbage only lands in rows/cols that are never
    # written back to the (B, N) output.
    Kp = _round_up(K, tk)
    multi_k = Kp > tk

    def workset(tm_, tn_, tk_, acc_):
        return (2 * tm_ * tk_ * itemsize          # x (double buffered)
                + 2 * tk_ * tn_ * itemsize        # weight
                + 2 * tn_ * 4                     # bias
                + 2 * tm_ * tn_ * itemsize        # output
                + (tm_ * tn_ * 4 if acc_ else 0))  # f32 accumulator

    # Defensive: shrink tiles until the working set fits the VMEM budget.
    while workset(tm, tn, tk, multi_k) > budget and (tk > 128 or tn > 128
                                                     or tm > sub):
        if tk > 128:
            tk = max(128, tk // 2)
            Kp = _round_up(K, tk)
            multi_k = Kp > tk
        elif tn > 128:
            tn = max(128, tn // 2)
        else:
            tm = max(sub, tm // 2)

    xp = x if Kp == K else jnp.pad(x, ((0, 0), (0, Kp - K)))

    if w_k_major is None:
        # Pre-transposing costs one HBM pass of the weight; worth it whenever
        # the weight is re-streamed across >1 batch tile.  (For static
        # inference weights, do the transpose once at weight-load time.)
        w_k_major = pl.cdiv(B, tm) > 1
    if w_k_major:
        wt = weight.T                                     # (K, N)
        wp = wt if Kp == K else jnp.pad(wt, ((0, Kp - K), (0, 0)))
        w_spec_multi = pl.BlockSpec((tk, tn), lambda j, i, k: (k, j))
        w_spec_single = pl.BlockSpec((tk, tn), lambda j, i: (0, j))
    else:
        wp = weight if Kp == K else jnp.pad(weight, ((0, 0), (0, Kp - K)))
        w_spec_multi = pl.BlockSpec((tn, tk), lambda j, i, k: (j, k))
        w_spec_single = pl.BlockSpec((tn, tk), lambda j, i: (j, 0))

    bp = bias.reshape(1, N)

    n_j, n_i = pl.cdiv(N, tn), pl.cdiv(B, tm)
    cost = pl.CostEstimate(
        flops=2 * B * N * K,
        # Re-streamed traffic: x read once per output-column tile, weight once
        # per batch tile, output written once.
        bytes_accessed=int(itemsize * (B * Kp * n_j + N * Kp * n_i + B * N)
                           + 4 * N * n_i),
        transcendentals=0,
    )
    out_shape = jax.ShapeDtypeStruct((B, N), x.dtype)

    if multi_k:
        kernel = functools.partial(_fc_kernel_multi, relu=relu,
                                   w_k_major=w_k_major)
        # Grid: j (output cols) outermost so the bias/weight column tile stays
        # resident across the batch sweep; k (reduction) innermost.
        out = pl.pallas_call(
            kernel,
            out_shape=out_shape,
            grid_spec=pltpu.PrefetchScalarGridSpec(
                num_scalar_prefetch=0,
                grid=(n_j, n_i, Kp // tk),
                in_specs=[
                    pl.BlockSpec((tm, tk), lambda j, i, k: (i, k)),   # x
                    w_spec_multi,                                     # weight
                    pl.BlockSpec((1, tn), lambda j, i, k: (0, j)),    # bias
                ],
                out_specs=pl.BlockSpec((tm, tn), lambda j, i, k: (i, j)),
                scratch_shapes=[pltpu.VMEM((tm, tn), jnp.float32)],
            ),
            compiler_params=pltpu.CompilerParams(
                dimension_semantics=("parallel", "parallel", "arbitrary"),
                vmem_limit_bytes=budget,
            ),
            cost_estimate=cost,
        )(xp, wp, bp)
    else:
        kernel = functools.partial(_fc_kernel_single, relu=relu,
                                   w_k_major=w_k_major)
        out = pl.pallas_call(
            kernel,
            out_shape=out_shape,
            grid_spec=pltpu.PrefetchScalarGridSpec(
                num_scalar_prefetch=0,
                grid=(n_j, n_i),
                in_specs=[
                    pl.BlockSpec((tm, tk), lambda j, i: (i, 0)),      # x
                    w_spec_single,                                    # weight
                    pl.BlockSpec((1, tn), lambda j, i: (0, j)),       # bias
                ],
                out_specs=pl.BlockSpec((tm, tn), lambda j, i: (i, j)),
            ),
            compiler_params=pltpu.CompilerParams(
                dimension_semantics=("parallel", "parallel"),
                vmem_limit_bytes=budget,
            ),
            cost_estimate=cost,
        )(xp, wp, bp)
    return out


if __name__ == "__main__":
    key = jax.random.PRNGKey(0)
    kx, kw, kb, kx2, kw2, kb2 = jax.random.split(key, 6)

    # Small shapes consistent with the module: batch=8, in_size=32, out_size=64.
    batch, in_size, out_size = 8, 32, 64
    x = jax.random.normal(kx, (batch, in_size), dtype=jnp.float32)
    bound = 1.0 / (in_size ** 0.5)
    w = jax.random.uniform(kw, (out_size, in_size), jnp.float32, -bound, bound)
    b = jax.random.uniform(kb, (out_size,), jnp.float32, -bound, bound)

    ref_mm = lax.dot_general(x, w, (((1,), (1,)), ((), ())),
                             precision=lax.Precision.HIGHEST) + b

    out = jax.block_until_ready(fully_connect(x, w, b, relu=True))
    assert out.shape == (batch, out_size)
    assert jnp.allclose(out, jnp.maximum(ref_mm, 0.0), atol=2e-3, rtol=2e-3)

    out_nr = jax.block_until_ready(fully_connect(x, w, b, relu=False))
    assert jnp.allclose(out_nr, ref_mm, atol=2e-3, rtol=2e-3)

    # Exercise the multi-k accumulator path, both weight layouts and ragged
    # (non tile-multiple) B / N edges.
    batch2, in2, out2 = 20, 1536, 200
    x2 = jax.random.normal(kx2, (batch2, in2), dtype=jnp.float32)
    bound2 = 1.0 / (in2 ** 0.5)
    w2 = jax.random.uniform(kw2, (out2, in2), jnp.float32, -bound2, bound2)
    b2 = jax.random.uniform(kb2, (out2,), jnp.float32, -bound2, bound2)
    ref2 = jnp.maximum(
        lax.dot_general(x2, w2, (((1,), (1,)), ((), ())),
                        precision=lax.Precision.HIGHEST) + b2, 0.0)

    out2_a = jax.block_until_ready(
        fully_connect(x2, w2, b2, relu=True, tk=512, w_k_major=True))
    out2_b = jax.block_until_ready(
        fully_connect(x2, w2, b2, relu=True, tk=512, w_k_major=False))
    assert jnp.allclose(out2_a, ref2, atol=2e-3, rtol=2e-3)
    assert jnp.allclose(out2_b, ref2, atol=2e-3, rtol=2e-3)

    print("KERNEL_OK")
</pallas_src>

<mosaic_0001>
module attributes {stable_mosaic.version = 11 : i64} {
  func.func @_fc_kernel_single(%arg0: i32, %arg1: i32, %arg2: memref<8x128xf32, #tpu.memory_space<vmem>>, %arg3: memref<128x128xf32, #tpu.memory_space<vmem>>, %arg4: memref<1x128xf32, #tpu.memory_space<vmem>>, %arg5: memref<8x128xf32, #tpu.memory_space<vmem>>) attributes {dimension_semantics = [#tpu.dimension_semantics<parallel>, #tpu.dimension_semantics<parallel>], iteration_bounds = array<i64: 1, 1>, scalar_prefetch = 0 : i64, scratch_operands = 0 : i64, tpu.core_type = #tpu.core_type<tc>, window_params = [{transform_indices = @transform_0, window_bounds = array<i64: 8, 128>}, {transform_indices = @transform_1, window_bounds = array<i64: 128, 128>}, {transform_indices = @transform_2, window_bounds = array<i64: 1, 128>}, {transform_indices = @transform_3, window_bounds = array<i64: 8, 128>}]} {
    %c0 = arith.constant 0 : index
    %c0_0 = arith.constant 0 : index
    %0 = vector.load %arg2[%c0, %c0_0] : memref<8x128xf32, #tpu.memory_space<vmem>>, vector<8x128xf32>
    %c0_1 = arith.constant 0 : index
    %c0_2 = arith.constant 0 : index
    %1 = vector.load %arg3[%c0_1, %c0_2] : memref<128x128xf32, #tpu.memory_space<vmem>>, vector<128x128xf32>
    %cst = arith.constant dense<0.000000e+00> : vector<8x128xf32>
    %2 = tpu.matmul %0, %1, %cst {dimension_numbers = #tpu.dot_dimension_numbers<[1], [1], [0], [0], [0, 0, 1, 0], [], []>} : vector<8x128xf32>, vector<128x128xf32>, vector<8x128xf32> -> vector<8x128xf32>
    %c0_3 = arith.constant 0 : index
    %c0_4 = arith.constant 0 : index
    %3 = vector.load %arg4[%c0_3, %c0_4] : memref<1x128xf32, #tpu.memory_space<vmem>>, vector<1x128xf32>
    %4 = vector.broadcast %3 : vector<1x128xf32> to vector<8x128xf32>
    %5 = arith.addf %2, %4 : vector<8x128xf32>
    %cst_5 = arith.constant 0.000000e+00 : f32
    %6 = vector.broadcast %cst_5 : f32 to vector<8x128xf32>
    %7 = arith.maximumf %5, %6 : vector<8x128xf32>
    %c0_6 = arith.constant 0 : index
    %c0_7 = arith.constant 0 : index
    %8 = vector.load %arg5[%c0_6, %c0_7] : memref<8x128xf32, #tpu.memory_space<vmem>>, vector<8x128xf32>
    tpu.vector_store %arg5[%c0_6, %c0_7], %7 {strides = array<i32>} : memref<8x128xf32, #tpu.memory_space<vmem>>, vector<8x128xf32>,
    return
  }
  func.func @transform_0(%arg0: i32, %arg1: i32) -> (i32, i32) {
    %c0_i32 = arith.constant 0 : i32
    %c0_i32_0 = arith.constant 0 : i32
    return %arg1, %c0_i32 : i32, i32
  }
  func.func @transform_1(%arg0: i32, %arg1: i32) -> (i32, i32) {
    %c0_i32 = arith.constant 0 : i32
    %c0_i32_0 = arith.constant 0 : i32
    return %arg0, %c0_i32 : i32, i32
  }
  func.func @transform_2(%arg0: i32, %arg1: i32) -> (i32, i32) {
    %c0_i32 = arith.constant 0 : i32
    %c0_i32_0 = arith.constant 0 : i32
    return %c0_i32, %arg0 : i32, i32
  }
  func.func @transform_3(%arg0: i32, %arg1: i32) -> (i32, i32) {
    %c0_i32 = arith.constant 0 : i32
    return %arg1, %arg0 : i32, i32
  }
}

</mosaic_0001>

<bundles_post_ra>
// kernel: tpu_custom_call.1
= control target key start
LH: loop header
LB: loop body
LE: loop exit
PB: predicated region body
PF: predicated region fallthrough
CT: control target
= control target key end

     0   :  { %8 = vsyncpa [#allocation3], 0  ;;  %s377_s0 = inlined_call_operand.hbm [shape: f32[8,128], index: 0, kind: input, shape index: {}]   ;;  %s378_s1 = inlined_call_operand.hbm [shape: f32[64,128], index: 1, kind: input, shape index: {}]   ;;  %s379_s2 = inlined_call_operand.vmem [shape: f32[1,64], index: 2, kind: input, shape index: {}]   ;;  %s380_s3 = inlined_call_operand.hbm [shape: f32[8,64], index: 3, kind: output, shape index: {}]  }
   0x1   :  { %9 = vsyncpa [#allocation6], 0 }
   0x2   :  { %10 = vsyncpa [#allocation4], 0  ;;  %s310_s12 = smov [#allocation2]   ;;  %s238_s16 = scalar_lea.hbm %s377_s0, 128 }
   0x3   :  { %s17_s13 = sshll.u32 %s310_s12, 4  ;;  %p239_p0 = scmp.ne.s32.totalorder %s377_s0, %s238_s16  ;;  %s18_s13 = int_to_ptr.vmem [resolvable:$true] %s17_s13 }
   0x4   :  { %p242_p1 = scmp.lt.u32.totalorder %s238_s16, %s377_s0 }
   0x6   :  { %p244_p2 = pnand %p242_p1, %p239_p0 }
   0x8   :  { %247 = shalt.err (!%p244_p2)
}
   0x9   :  { %s248_s21 = scalar_lea.vmem %s18_s13, 128  ;;  %p253_p4 = scmp.lt.s32.totalorder %s18_s13, %s18_s13 }
   0xa   :  { %p249_p3 = scmp.ne.s32.totalorder %s18_s13, %s248_s21  ;;  %p254_p5 = scmp.lt.s32.totalorder %s248_s21, %s248_s21 }
   0xc   :  { %p255_p6 = por %p254_p5, %p253_p4 }
   0xe   :  { %p256_p7 = pnand %p255_p6, %p249_p3 }
  0x10   :  { %259 = shalt.err (!%p256_p7)
}
  0x11   :  { %20 = dma.hbm_to_vmem [thread:$0]  %s377_s0, 128, %s18_s13, [#allocation3]  }
  0x12   :  { %25 = vsyncadd [#allocation6], 1024  ;;  %s311_s24 = smov [#allocation5]   ;;  %s260_s28 = scalar_lea.hbm %s378_s1, 1024 }
  0x13   :  { %s26_s25 = sshll.u32 %s311_s24, 4  ;;  %p261_p8 = scmp.ne.s32.totalorder %s378_s1, %s260_s28  ;;  %s27_s25 = int_to_ptr.vmem [resolvable:$true] %s26_s25 }
  0x14   :  { %p264_p9 = scmp.lt.u32.totalorder %s260_s28, %s378_s1 }
  0x16   :  { %p266_p10 = pnand %p264_p9, %p261_p8 }
  0x18   :  { %269 = shalt.err (!%p266_p10)
}
  0x19   :  { %s270_s6 = scalar_lea.vmem %s27_s25, 1024  ;;  %s274_s0 = scalar_lea.vmem %s27_s25, 2048 }
  0x1a   :  { %p271_p11 = scmp.ne.s32.totalorder %s27_s25, %s270_s6  ;;  %p275_p12 = scmp.lt.s32.totalorder %s27_s25, %s27_s25 }
  0x1b   :  { %p276_p13 = scmp.lt.s32.totalorder %s274_s0, %s270_s6 }
  0x1d   :  { %p277_p0 = por %p276_p13, %p275_p12 }
  0x1f   :  { %p278_p1 = pnand %p277_p0, %p271_p11 }
  0x21   :  { %281 = shalt.err (!%p278_p1)
}
  0x22   :  { %s312_s7 = smov 128   ;;  %s313_s8 = smov 8  }
  0x23   :  { %32 = dma.hbm_to_vmem [thread:$0]  %s378_s1, 1024, %s27_s25, [#allocation6], %s312_s7, %s312_s7, %s313_s8  }
  0x24   :  { %304 = dma.done.wait [#allocation3], 128  }
  0x25   :  { %305 = vsyncadd [#allocation3], 4294967168 }
  0x26   :  { %306 = dma.done.wait [#allocation6], 2048  }
  0x27   :  { %307 = vsyncadd [#allocation6], 4294965248  ;;  %v314_v0 = vmov 0.0|0.0   ;;  %vm315_vm0 = vmmov 0   ;;  %v316_v1 = vmov 0.0   ;;  %v42_v2 = vld [vmem:[#allocation5] sm:$0xff] }
  0x28   :  { %206 = vmatprep.subr.bf16.mxu0 %v314_v0  ;;  %203 = vmatprep.mubr.msk.f32.mxu0 %vm315_vm0, %v316_v1  ;;  %v43_v3 = vld [vmem:[#allocation5 + $0x8] sm:$0xff]  ;;  %v44_v5 = vld [vmem:[#allocation5 + $0x10] sm:$0xff]  ;;  %v45_v6 = vld [vmem:[#allocation5 + $0x18] sm:$0xff]  ;;  %s317_s12 = smov [#allocation7]  }
  0x29   :  { %v207_v4 = vpack.c.bf16 %v43_v3, %v42_v2  ;;  %v210_v7 = vpack.c.bf16 %v45_v6, %v44_v5  ;;  %v46_v8 = vld [vmem:[#allocation5 + $0x20] sm:$0xff]  ;;  %v47_v9 = vld [vmem:[#allocation5 + $0x28] sm:$0xff]  ;;  %v48_v11 = vld [vmem:[#allocation5 + $0x30] sm:$0xff]  ;;  %s143_s13 = sshll.u32 %s317_s12, 4  ;;  %s144_s13 = int_to_ptr.vmem [resolvable:$true] %s143_s13 }
  0x2a   :  { %v213_v10 = vpack.c.bf16 %v47_v9, %v46_v8  ;;  %v49_v12 = vld [vmem:[#allocation5 + $0x38] sm:$0xff]  ;;  %v50_v14 = vld [vmem:[#allocation5 + $0x40] sm:$0xff]  ;;  %v51_v15 = vld [vmem:[#allocation5 + $0x48] sm:$0xff]  ;;  %s282_s14 = scalar_lea.vmem %s144_s13, 128  ;;  %p287_p3 = scmp.lt.s32.totalorder %s144_s13, %s144_s13 }
  0x2b   :  { %208 = vmatpush3.bf16.xpose.msra.mxu0 %v207_v4  ;;  %v216_v13 = vpack.c.bf16 %v49_v12, %v48_v11  ;;  %v219_v16 = vpack.c.bf16 %v51_v15, %v50_v14  ;;  %v52_v17 = vld [vmem:[#allocation5 + $0x50] sm:$0xff]  ;;  %v53_v18 = vld [vmem:[#allocation5 + $0x58] sm:$0xff]  ;;  %v54_v20 = vld [vmem:[#allocation5 + $0x60] sm:$0xff]  ;;  %p283_p2 = scmp.ne.s32.totalorder %s144_s13, %s282_s14  ;;  %p288_p4 = scmp.lt.s32.totalorder %s282_s14, %s282_s14 }
  0x2c   :  { %209 = vmatprep.subr.bf16.mxu0 %v314_v0  ;;  %v222_v19 = vpack.c.bf16 %v53_v18, %v52_v17  ;;  %v55_v21 = vld [vmem:[#allocation5 + $0x68] sm:$0xff]  ;;  %v56_v23 = vld [vmem:[#allocation5 + $0x70] sm:$0xff]  ;;  %v57_v24 = vld [vmem:[#allocation5 + $0x78] sm:$0xff] }
  0x2d   :  { %v225_v22 = vpack.c.bf16 %v55_v21, %v54_v20  ;;  %v228_v25 = vpack.c.bf16 %v57_v24, %v56_v23  ;;  %v41_v26 = vld [vmem:[#allocation2] sm:$0xff]  ;;  %p289_p5 = por %p288_p4, %p287_p3 }
  0x2e   :  { %v153_v27 = vld [vmem:[%s379_s2] ss:$0 sm:$0xff] }
  0x2f   :  { %p290_p6 = pnand %p289_p5, %p283_p2 }
  0x33   :  { %211 = vmatpush3.bf16.xpose.msra.mxu0 %v210_v7 }
  0x34   :  { %212 = vmatprep.subr.bf16.mxu0 %v314_v0 }
  0x3b   :  { %214 = vmatpush3.bf16.xpose.msra.mxu0 %v213_v10 }
  0x3c   :  { %215 = vmatprep.subr.bf16.mxu0 %v314_v0 }
  0x43   :  { %217 = vmatpush3.bf16.xpose.msra.mxu0 %v216_v13 }
  0x44   :  { %218 = vmatprep.subr.bf16.mxu0 %v314_v0 }
  0x4b   :  { %220 = vmatpush3.bf16.xpose.msra.mxu0 %v219_v16 }
  0x4c   :  { %221 = vmatprep.subr.bf16.mxu0 %v314_v0 }
  0x53   :  { %223 = vmatpush3.bf16.xpose.msra.mxu0 %v222_v19 }
  0x54   :  { %224 = vmatprep.subr.bf16.mxu0 %v314_v0 }
  0x5b   :  { %226 = vmatpush3.bf16.xpose.msra.mxu0 %v225_v22 }
  0x5c   :  { %227 = vmatprep.subr.bf16.mxu0 %v314_v0 }
  0x63   :  { %229 = vmatpush3.bf16.xpose.msra.mxu0 %v228_v25 }
  0x6a   :  { %204 = vmatmul.mubr.f32.vlgmr.msra.gmra.mrb[0].mxu0 %v41_v26 }
 0x13d   :  { %v131_v28 = vpop.f32.mrb[0].mxu0 }
 0x13e   :  { %v132_v29 = vadd.f32 %v153_v27, %v131_v28  ;;  %v205_v30 = vpop.f32.mrb[1].mxu0 }
 0x140   :  { %v135_v31 = vmax.f32 %v132_v29, 0.0 }
 0x142   :  { %136 = vst [vmem:[#allocation7] sm:$0xff] %v135_v31 }
 0x143   :  { %293 = shalt.err (!%p290_p6)
}
 0x144   :  { %s294_s17 = scalar_lea.hbm %s380_s3, 128 }
 0x145   :  { %p295_p7 = scmp.ne.s32.totalorder %s380_s3, %s294_s17  ;;  %p298_p8 = scmp.lt.u32.totalorder %s294_s17, %s380_s3 }
 0x147   :  { %p300_p9 = pnand %p298_p8, %p295_p7 }
 0x149   :  { %303 = shalt.err (!%p300_p9)
}
 0x14a   :  { %146 = dma.vmem_to_hbm [thread:$0]  %s144_s13, 128, %s380_s3, [#allocation4]  }
 0x14b   :  { %308 = dma.done.wait [#allocation4], 128  }
 0x14c   :  { %309 = vsyncadd [#allocation4], 4294967168 }
 0x14d   :  { %150 = vsyncpa [#allocation3], 1 }
 0x14e   :  { %151 = vsyncpa [#allocation6], 1 }
 0x14f   :  { %152 = vsyncpa [#allocation4], 1 }

</bundles_post_ra>
